<compile_context>
chip_gen: v7x
topology: tpu7x:2x2x1
jax: 0.10.0
libtpu: 0.0.40
codegen_flags: <defaults>
</compile_context>

<pallas_src>
import jax
import jax.numpy as jnp
from jax import lax
from jax.experimental import pallas as pl
from jax.experimental.pallas import tpu as pltpu

# ---------------- small synthetic config ----------------
B = 2                 # batch
SEQ = 8               # text sequence length
VOCAB = 30            # vocab size (stub embedding table)
BERT_H = 32           # stand-in for bert hidden_size (768)
RESNET_F = 64         # stand-in for resnet50 fc.in_features (2048)
MIDDLE = 32           # config.middle_hidden_size
D_MODEL = 2 * MIDDLE  # TransformerEncoderLayer d_model
NHEAD = 4             # config.attention_nhead (softmax over len-1 seq => identity)
FFN = 128             # dim_feedforward (PyTorch default 2048, scaled down)
OUT_H = 64            # config.out_hidden_size
NUM_LABELS = 3        # config.num_labels
IMG_C, IMG_H, IMG_W = 4, 16, 16
LN_EPS = 1e-5
LANE = 128
NEG_INF = -1e30

BT = 8                        # batch tile (one sublane group)
A_ROWS = BT * SEQ + 2 * BT    # activation-slab rows per tile: emb(64)+wrow(8)+gap(8)

# weight-slab block ids: each block is a [128,128] zero-padded [in,out] matrix (bf16).
(W_BACK, W_TRANS, W_ATTN, W_FFN1, W_FFN2, W_CLS1, W_CLS2) = range(7)
N_WBLK = 7
# bias-slab row ids: each row is a 128-lane padded f32 vector.
(B_BACK, B_TRANS, B_ATTN, LN1_G, LN1_B,
 B_FFN1, B_FFN2, LN2_G, LN2_B, B_CLS1, B_CLS2) = range(11)
N_BROW = 16   # padded to a sublane multiple


# =======================  Pallas kernel  =======================
def fuse_forward_kernel(act_ref, w_ref, b_ref, pred_ref):
    f32 = jnp.float32
    bf16 = jnp.bfloat16

    def wblk(i):                      # [128, 128] bf16 weight block (VMEM resident)
        return w_ref[i]

    def brow(i):                      # [1, 128] f32 bias row, broadcasts over batch
        return b_ref[i:i + 1, :]

    def dense(x, i_w, i_b):           # bf16 MXU matmul, f32 accumulate, f32 bias
        return jnp.dot(x.astype(bf16), wblk(i_w),
                       preferred_element_type=f32) + brow(i_b)

    # ------------ unpack the per-tile activation slab ------------
    emb = act_ref[0:BT * SEQ, :]                  # [64,128] token embeddings (lanes 0:32)
    wrow = act_ref[BT * SEQ:BT * SEQ + BT, :]     # [8,128] block-diag mask/len weights
    gap_row = act_ref[BT * SEQ + BT:A_ROWS, :]    # [8,128] image GAP (lanes 32:36)

    lane = lax.broadcasted_iota(jnp.int32, (BT, LANE), 1)

    # ---------------- text pooling (one MXU contraction) ----------------
    pooled = jnp.dot(wrow[:, :BT * SEQ].astype(bf16), emb.astype(bf16),
                     preferred_element_type=f32)          # [BT,128], lanes 0:32

    # ---------------- fused backbone stubs (block-diagonal) ----------------
    # TODO(synk): stubs for the pretrained BERT encoder pooler / ResNet-50 backbone.
    back_in = pooled + gap_row                 # lane-disjoint: text 0:32, gap 32:36
    pre = dense(back_in, W_BACK, B_BACK)       # pooler pre 0:32 | resnet pre 32:96
    feat = jnp.where(lane < BERT_H, jnp.tanh(pre), jnp.maximum(pre, 0.0))

    # ------- fused .trans layers: concat([text, img]) == lane placement -------
    x = jnp.maximum(dense(feat, W_TRANS, B_TRANS), 0.0)   # real lanes 0:D_MODEL, rest 0

    dmask = (lane < D_MODEL).astype(f32)

    def layer_norm(h, i_g, i_b):               # biased variance, like PyTorch, f32
        mu = jnp.sum(h, axis=-1, keepdims=True) * (1.0 / D_MODEL)
        hc = (h - mu) * dmask                  # keep padded lanes at exactly 0
        var = jnp.sum(hc * hc, axis=-1, keepdims=True) * (1.0 / D_MODEL)
        return hc * lax.rsqrt(var + LN_EPS) * brow(i_g) + brow(i_b)

    # ---- TransformerEncoderLayer, post-norm, eval mode, seq_len == 1 ----
    # softmax over a single key == 1  ->  attention == out_proj(v_proj(x));
    # residual folded into W_ATTN in the wrapper: x + attn == x @ (WvWo + I) + b.
    h = layer_norm(dense(x, W_ATTN, B_ATTN), LN1_G, LN1_B)

    ff = jnp.maximum(dense(h, W_FFN1, B_FFN1), 0.0)
    h2 = layer_norm(h + dense(ff, W_FFN2, B_FFN2), LN2_G, LN2_B)

    # ---------------- classifier ----------------
    c = jnp.maximum(dense(h2, W_CLS1, B_CLS1), 0.0)
    logits = dense(c, W_CLS2, B_CLS2)          # lanes >= NUM_LABELS carry -1e30 bias

    # ---------------- fused argmax (first maximal index) ----------------
    mx = jnp.max(logits, axis=-1, keepdims=True)
    cand = jnp.where(logits == mx, lane, LANE)
    pred = jnp.min(cand, axis=-1, keepdims=True)          # [BT,1] int32
    # lane-dense unmasked store; wrapper reads lane 0.
    pred_ref[...] = jnp.broadcast_to(pred, (BT, LANE))


# =======================  parameter construction  =======================
def init_params(key):
    """Deterministic synthetic parameters. Linear weights stored as [in, out]."""
    ks = jax.random.split(key, 16)
    s = 0.05
    p = {}
    p["emb_table"] = s * jax.random.normal(ks[0], (VOCAB, BERT_H), jnp.float32)
    # bert pooler stub
    p["wp"] = s * jax.random.normal(ks[1], (BERT_H, BERT_H), jnp.float32)
    p["bp"] = jnp.zeros((BERT_H,), jnp.float32)
    # text trans
    p["wt"] = s * jax.random.normal(ks[2], (BERT_H, MIDDLE), jnp.float32)
    p["bt"] = jnp.zeros((MIDDLE,), jnp.float32)
    # resnet stem stub + image trans
    p["wstem"] = s * jax.random.normal(ks[3], (IMG_C, RESNET_F), jnp.float32)
    p["bstem"] = jnp.zeros((RESNET_F,), jnp.float32)
    p["wi"] = s * jax.random.normal(ks[4], (RESNET_F, MIDDLE), jnp.float32)
    p["bi"] = jnp.zeros((MIDDLE,), jnp.float32)
    # transformer encoder layer (value / out projections + FFN + layer norms)
    p["wv"] = s * jax.random.normal(ks[5], (D_MODEL, D_MODEL), jnp.float32)
    p["bv"] = jnp.zeros((D_MODEL,), jnp.float32)
    p["wo"] = s * jax.random.normal(ks[6], (D_MODEL, D_MODEL), jnp.float32)
    p["bo"] = jnp.zeros((D_MODEL,), jnp.float32)
    p["ln1g"] = jnp.ones((D_MODEL,), jnp.float32)
    p["ln1b"] = jnp.zeros((D_MODEL,), jnp.float32)
    p["w1"] = s * jax.random.normal(ks[7], (D_MODEL, FFN), jnp.float32)
    p["b1"] = jnp.zeros((FFN,), jnp.float32)
    p["w2"] = s * jax.random.normal(ks[8], (FFN, D_MODEL), jnp.float32)
    p["b2"] = jnp.zeros((D_MODEL,), jnp.float32)
    p["ln2g"] = jnp.ones((D_MODEL,), jnp.float32)
    p["ln2b"] = jnp.zeros((D_MODEL,), jnp.float32)
    # classifier
    p["wc1"] = s * jax.random.normal(ks[9], (D_MODEL, OUT_H), jnp.float32)
    p["bc1"] = jnp.zeros((OUT_H,), jnp.float32)
    p["wc2"] = s * jax.random.normal(ks[10], (OUT_H, NUM_LABELS), jnp.float32)
    p["bc2"] = jnp.zeros((NUM_LABELS,), jnp.float32)
    return p


def pack_params(p):
    """Fold eval-mode constants and pack all weights/biases into two VMEM slabs."""
    # seq_len == 1 attention: out_proj(v_proj(x)) == x @ (Wv @ Wo) + (bv @ Wo + bo);
    # fold the residual too: x + attn == x @ (Wv @ Wo + I) + (bv @ Wo + bo).
    w_attn = p["wv"] @ p["wo"] + jnp.eye(D_MODEL, dtype=jnp.float32)
    b_attn = p["bv"] @ p["wo"] + p["bo"]

    wblocks = [jnp.zeros((LANE, LANE), jnp.float32) for _ in range(N_WBLK)]

    def wput(idx, w, row_off=0, col_off=0):
        wblocks[idx] = wblocks[idx].at[row_off:row_off + w.shape[0],
                                       col_off:col_off + w.shape[1]].set(w)

    # fused backbone stubs (block-diagonal): BERT pooler + ResNet stem
    wput(W_BACK, p["wp"], 0, 0)                    # rows 0:32  -> cols 0:32
    wput(W_BACK, p["wstem"], BERT_H, BERT_H)       # rows 32:36 -> cols 32:96
    # fused .trans layers (block-diagonal): output lane placement == concat
    wput(W_TRANS, p["wt"], 0, 0)                   # rows 0:32  -> cols 0:32 (text)
    wput(W_TRANS, p["wi"], BERT_H, MIDDLE)         # rows 32:96 -> cols 32:64 (image)
    wput(W_ATTN, w_attn)
    wput(W_FFN1, p["w1"])
    wput(W_FFN2, p["w2"])
    wput(W_CLS1, p["wc1"])
    wput(W_CLS2, p["wc2"])
    w_slab = jnp.stack(wblocks, axis=0).astype(jnp.bfloat16)   # [7,128,128] bf16

    brows = [jnp.zeros((LANE,), jnp.float32) for _ in range(N_BROW)]

    def bput(idx, b, off=0):
        brows[idx] = brows[idx].at[off:off + b.shape[-1]].set(b.reshape(-1))

    bput(B_BACK, p["bp"], 0)
    bput(B_BACK, p["bstem"], BERT_H)
    bput(B_TRANS, p["bt"], 0)
    bput(B_TRANS, p["bi"], MIDDLE)
    bput(B_ATTN, b_attn)
    bput(LN1_G, p["ln1g"])
    bput(LN1_B, p["ln1b"])
    bput(B_FFN1, p["b1"])
    bput(B_FFN2, p["b2"])
    bput(LN2_G, p["ln2g"])
    bput(LN2_B, p["ln2b"])
    bput(B_CLS1, p["bc1"])
    brows[B_CLS2] = jnp.full((LANE,), NEG_INF, jnp.float32).at[:NUM_LABELS].set(p["bc2"])
    b_slab = jnp.stack(brows, axis=0)                          # [16,128] f32
    return w_slab, b_slab


# =======================  wrapper  =======================
def _pad_batch(x, b_pad):
    pad = b_pad - x.shape[0]
    if pad == 0:
        return x
    return jnp.concatenate([x, jnp.zeros((pad,) + x.shape[1:], x.dtype)], axis=0)


def fuse_model_forward(texts, texts_mask, imgs, emb_table, w_slab, b_slab):
    """FuseModel.forward (inference path: labels=None -> returns pred_labels)."""
    f32 = jnp.float32
    b = texts.shape[0]
    nb = -(-b // BT)          # batch tiles
    b_pad = nb * BT

    texts_p = _pad_batch(texts, b_pad)
    mask_p = _pad_batch(texts_mask, b_pad)
    imgs_p = _pad_batch(imgs, b_pad)

    # TODO(synk): embedding gather stays as wrapper glue (no clean rectangular DMA).
    emb = emb_table[texts_p].reshape(b_pad * SEQ, BERT_H)
    emb_rows = jnp.zeros((b_pad * SEQ, LANE), f32).at[:, :BERT_H].set(emb)

    # masked-mean pooling as block-diagonal per-tile weights so the reduction runs
    # on the MXU in-kernel; msum clamped (no NaN for all-padding rows).
    mask = mask_p.astype(f32)
    msum = jnp.maximum(jnp.sum(mask, axis=1, keepdims=True), 1.0)
    wr = mask / msum                                              # [b_pad, SEQ]
    onehot = jax.nn.one_hot(jnp.arange(b_pad) % BT, BT, dtype=f32)
    wrow = (onehot[:, :, None] * wr[:, None, :]).reshape(b_pad, BT * SEQ)
    wrow_rows = jnp.zeros((b_pad, LANE), f32).at[:, :BT * SEQ].set(wrow)

    # glue for the stubbed ResNet backbone: NCHW global average pool, lane-shifted
    # so it lands disjoint from the pooled text lanes inside the kernel.
    gap = jnp.mean(imgs_p, axis=(2, 3))
    gap_rows = jnp.zeros((b_pad, LANE), f32).at[:, BERT_H:BERT_H + IMG_C].set(gap)

    # one activation slab per batch tile: [emb(64) ; wrow(8) ; gap(8)] rows.
    act = jnp.concatenate(
        [emb_rows.reshape(nb, BT * SEQ, LANE),
         wrow_rows.reshape(nb, BT, LANE),
         gap_rows.reshape(nb, BT, LANE)], axis=1).reshape(nb * A_ROWS, LANE)

    pred_rows = pl.pallas_call(
        fuse_forward_kernel,
        out_shape=jax.ShapeDtypeStruct((nb * BT, LANE), jnp.int32),
        grid=(nb,),
        in_specs=[
            pl.BlockSpec((A_ROWS, LANE), lambda i: (i, 0)),            # per-tile acts
            pl.BlockSpec((N_WBLK, LANE, LANE), lambda i: (0, 0, 0)),   # resident weights
            pl.BlockSpec((N_BROW, LANE), lambda i: (0, 0)),            # resident biases
        ],
        out_specs=pl.BlockSpec((BT, LANE), lambda i: (i, 0)),
        compiler_params=pltpu.CompilerParams(
            dimension_semantics=("parallel",)),
    )(act, w_slab, b_slab)

    return pred_rows[:b, 0]        # torch.argmax(prob_vec, dim=1)


fuse_model_forward_jit = jax.jit(fuse_model_forward)


if __name__ == "__main__":
    key = jax.random.PRNGKey(0)
    k_param, k_text, k_img = jax.random.split(key, 3)

    params = init_params(k_param)
    w_slab, b_slab = pack_params(params)

    texts = jax.random.randint(k_text, (B, SEQ), 0, VOCAB, dtype=jnp.int32)
    # attention mask with some padding on the second example
    lengths = jnp.array([[SEQ], [SEQ - 2]], dtype=jnp.int32)
    texts_mask = (jnp.arange(SEQ, dtype=jnp.int32)[None, :] < lengths).astype(jnp.int32)
    imgs = jax.random.normal(k_img, (B, IMG_C, IMG_H, IMG_W), jnp.float32)

    pred = fuse_model_forward_jit(texts, texts_mask, imgs,
                                  params["emb_table"], w_slab, b_slab)
    jax.block_until_ready(pred)
    assert pred.shape == (B,)
    print("KERNEL_OK")
</pallas_src>

<mosaic_0001>
module attributes {stable_mosaic.version = 11 : i64} {
  func.func @fuse_forward_kernel(%arg0: i32, %arg1: memref<80x128xf32, #tpu.memory_space<vmem>>, %arg2: memref<7x128x128xbf16, #tpu.memory_space<vmem>>, %arg3: memref<16x128xf32, #tpu.memory_space<vmem>>, %arg4: memref<8x128xi32, #tpu.memory_space<vmem>>) attributes {dimension_semantics = [#tpu.dimension_semantics<parallel>], iteration_bounds = array<i64: 1>, scalar_prefetch = 0 : i64, scratch_operands = 0 : i64, tpu.core_type = #tpu.core_type<tc>, window_params = [{transform_indices = @transform_0, window_bounds = array<i64: 80, 128>}, {pipeline_mode = #tpu.pipeline_mode<synchronous>, transform_indices = @transform_1, window_bounds = array<i64: 7, 128, 128>}, {pipeline_mode = #tpu.pipeline_mode<synchronous>, transform_indices = @transform_2, window_bounds = array<i64: 16, 128>}, {transform_indices = @transform_3, window_bounds = array<i64: 8, 128>}]} {
    %c0 = arith.constant 0 : index
    %c0_0 = arith.constant 0 : index
    %0 = vector.load %arg1[%c0, %c0_0] : memref<80x128xf32, #tpu.memory_space<vmem>>, vector<64x128xf32>
    %c64 = arith.constant 64 : index
    %c0_1 = arith.constant 0 : index
    %1 = vector.load %arg1[%c64, %c0_1] : memref<80x128xf32, #tpu.memory_space<vmem>>, vector<8x128xf32>
    %c72 = arith.constant 72 : index
    %c0_2 = arith.constant 0 : index
    %2 = vector.load %arg1[%c72, %c0_2] : memref<80x128xf32, #tpu.memory_space<vmem>>, vector<8x128xf32>
    %3 = tpu.iota {dimensions = array<i32: 1>} : vector<8x128xi32>
    %4 = vector.extract_strided_slice %1 {offsets = [0, 0], sizes = [8, 64], strides = [1, 1]} : vector<8x128xf32> to vector<8x64xf32>
    %5 = arith.truncf %4 : vector<8x64xf32> to vector<8x64xbf16>
    %6 = arith.truncf %0 : vector<64x128xf32> to vector<64x128xbf16>
    %cst = arith.constant dense<0.000000e+00> : vector<8x128xf32>
    %7 = tpu.matmul %5, %6, %cst {dimension_numbers = #tpu.dot_dimension_numbers<[1], [0], [0], [1], [0, 0, 1, 1], [], []>} : vector<8x64xbf16>, vector<64x128xbf16>, vector<8x128xf32> -> vector<8x128xf32>
    %8 = arith.addf %7, %2 : vector<8x128xf32>
    %9 = arith.truncf %8 : vector<8x128xf32> to vector<8x128xbf16>
    %c0_3 = arith.constant 0 : index
    %c0_4 = arith.constant 0 : index
    %c0_5 = arith.constant 0 : index
    %10 = vector.load %arg2[%c0_3, %c0_4, %c0_5] : memref<7x128x128xbf16, #tpu.memory_space<vmem>>, vector<1x128x128xbf16>
    %11 = vector.shape_cast %10 : vector<1x128x128xbf16> to vector<128x128xbf16>
    %cst_6 = arith.constant dense<0.000000e+00> : vector<8x128xf32>
    %12 = tpu.matmul %9, %11, %cst_6 {dimension_numbers = #tpu.dot_dimension_numbers<[1], [0], [0], [1], [0, 0, 1, 1], [], []>} : vector<8x128xbf16>, vector<128x128xbf16>, vector<8x128xf32> -> vector<8x128xf32>
    %c0_7 = arith.constant 0 : index
    %c0_8 = arith.constant 0 : index
    %13 = vector.load %arg3[%c0_7, %c0_8] : memref<16x128xf32, #tpu.memory_space<vmem>>, vector<1x128xf32>
    %14 = vector.broadcast %13 : vector<1x128xf32> to vector<8x128xf32>
    %15 = arith.addf %12, %14 : vector<8x128xf32>
    %c32_i32 = arith.constant 32 : i32
    %16 = vector.broadcast %c32_i32 : i32 to vector<8x128xi32>
    %17 = arith.cmpi slt, %3, %16 : vector<8x128xi32>
    %18 = math.tanh %15 : vector<8x128xf32>
    %cst_9 = arith.constant 0.000000e+00 : f32
    %19 = vector.broadcast %cst_9 : f32 to vector<8x128xf32>
    %20 = arith.maximumf %15, %19 : vector<8x128xf32>
    %21 = arith.select %17, %18, %20 : vector<8x128xi1>, vector<8x128xf32>
    %22 = arith.truncf %21 : vector<8x128xf32> to vector<8x128xbf16>
    %c1 = arith.constant 1 : index
    %c0_10 = arith.constant 0 : index
    %c0_11 = arith.constant 0 : index
    %23 = vector.load %arg2[%c1, %c0_10, %c0_11] : memref<7x128x128xbf16, #tpu.memory_space<vmem>>, vector<1x128x128xbf16>
    %24 = vector.shape_cast %23 : vector<1x128x128xbf16> to vector<128x128xbf16>
    %cst_12 = arith.constant dense<0.000000e+00> : vector<8x128xf32>
    %25 = tpu.matmul %22, %24, %cst_12 {dimension_numbers = #tpu.dot_dimension_numbers<[1], [0], [0], [1], [0, 0, 1, 1], [], []>} : vector<8x128xbf16>, vector<128x128xbf16>, vector<8x128xf32> -> vector<8x128xf32>
    %c1_13 = arith.constant 1 : index
    %c0_14 = arith.constant 0 : index
    %26 = vector.load %arg3[%c1_13, %c0_14] : memref<16x128xf32, #tpu.memory_space<vmem>>, vector<1x128xf32>
    %27 = vector.broadcast %26 : vector<1x128xf32> to vector<8x128xf32>
    %28 = arith.addf %25, %27 : vector<8x128xf32>
    %cst_15 = arith.constant 0.000000e+00 : f32
    %29 = vector.broadcast %cst_15 : f32 to vector<8x128xf32>
    %30 = arith.maximumf %28, %29 : vector<8x128xf32>
    %c64_i32 = arith.constant 64 : i32
    %31 = vector.broadcast %c64_i32 : i32 to vector<8x128xi32>
    %32 = arith.cmpi slt, %3, %31 : vector<8x128xi32>
    %33 = arith.extui %32 : vector<8x128xi1> to vector<8x128xi32>
    %34 = arith.sitofp %33 : vector<8x128xi32> to vector<8x128xf32>
    %35 = arith.truncf %30 : vector<8x128xf32> to vector<8x128xbf16>
    %c2 = arith.constant 2 : index
    %c0_16 = arith.constant 0 : index
    %c0_17 = arith.constant 0 : index
    %36 = vector.load %arg2[%c2, %c0_16, %c0_17] : memref<7x128x128xbf16, #tpu.memory_space<vmem>>, vector<1x128x128xbf16>
    %37 = vector.shape_cast %36 : vector<1x128x128xbf16> to vector<128x128xbf16>
    %cst_18 = arith.constant dense<0.000000e+00> : vector<8x128xf32>
    %38 = tpu.matmul %35, %37, %cst_18 {dimension_numbers = #tpu.dot_dimension_numbers<[1], [0], [0], [1], [0, 0, 1, 1], [], []>} : vector<8x128xbf16>, vector<128x128xbf16>, vector<8x128xf32> -> vector<8x128xf32>
    %c2_19 = arith.constant 2 : index
    %c0_20 = arith.constant 0 : index
    %39 = vector.load %arg3[%c2_19, %c0_20] : memref<16x128xf32, #tpu.memory_space<vmem>>, vector<1x128xf32>
    %40 = vector.broadcast %39 : vector<1x128xf32> to vector<8x128xf32>
    %41 = arith.addf %38, %40 : vector<8x128xf32>
    %cst_21 = arith.constant dense<0.000000e+00> : vector<8xf32>
    %42 = vector.multi_reduction <add>, %41, %cst_21 [1] : vector<8x128xf32> to vector<8xf32>
    %43 = vector.shape_cast %42 : vector<8xf32> to vector<8x1xf32>
    %cst_22 = arith.constant 1.562500e-02 : f32
    %44 = vector.broadcast %cst_22 : f32 to vector<8x1xf32>
    %45 = arith.mulf %43, %44 : vector<8x1xf32>
    %46 = vector.broadcast %45 : vector<8x1xf32> to vector<8x128xf32>
    %47 = arith.subf %41, %46 : vector<8x128xf32>
    %48 = arith.mulf %47, %34 : vector<8x128xf32>
    %49 = arith.mulf %48, %48 : vector<8x128xf32>
    %cst_23 = arith.constant dense<0.000000e+00> : vector<8xf32>
    %50 = vector.multi_reduction <add>, %49, %cst_23 [1] : vector<8x128xf32> to vector<8xf32>
    %51 = vector.shape_cast %50 : vector<8xf32> to vector<8x1xf32>
    %cst_24 = arith.constant 1.562500e-02 : f32
    %52 = vector.broadcast %cst_24 : f32 to vector<8x1xf32>
    %53 = arith.mulf %51, %52 : vector<8x1xf32>
    %cst_25 = arith.constant 9.99999974E-6 : f32
    %54 = vector.broadcast %cst_25 : f32 to vector<8x1xf32>
    %55 = arith.addf %53, %54 : vector<8x1xf32>
    %56 = math.rsqrt %55 : vector<8x1xf32>
    %57 = vector.broadcast %56 : vector<8x1xf32> to vector<8x128xf32>
    %58 = arith.mulf %48, %57 : vector<8x128xf32>
    %c3 = arith.constant 3 : index
    %c0_26 = arith.constant 0 : index
    %59 = vector.load %arg3[%c3, %c0_26] : memref<16x128xf32, #tpu.memory_space<vmem>>, vector<1x128xf32>
    %60 = vector.broadcast %59 : vector<1x128xf32> to vector<8x128xf32>
    %61 = arith.mulf %58, %60 : vector<8x128xf32>
    %c4 = arith.constant 4 : index
    %c0_27 = arith.constant 0 : index
    %62 = vector.load %arg3[%c4, %c0_27] : memref<16x128xf32, #tpu.memory_space<vmem>>, vector<1x128xf32>
    %63 = vector.broadcast %62 : vector<1x128xf32> to vector<8x128xf32>
    %64 = arith.addf %61, %63 : vector<8x128xf32>
    %65 = arith.truncf %64 : vector<8x128xf32> to vector<8x128xbf16>
    %c3_28 = arith.constant 3 : index
    %c0_29 = arith.constant 0 : index
    %c0_30 = arith.constant 0 : index
    %66 = vector.load %arg2[%c3_28, %c0_29, %c0_30] : memref<7x128x128xbf16, #tpu.memory_space<vmem>>, vector<1x128x128xbf16>
    %67 = vector.shape_cast %66 : vector<1x128x128xbf16> to vector<128x128xbf16>
    %cst_31 = arith.constant dense<0.000000e+00> : vector<8x128xf32>
    %68 = tpu.matmul %65, %67, %cst_31 {dimension_numbers = #tpu.dot_dimension_numbers<[1], [0], [0], [1], [0, 0, 1, 1], [], []>} : vector<8x128xbf16>, vector<128x128xbf16>, vector<8x128xf32> -> vector<8x128xf32>
    %c5 = arith.constant 5 : index
    %c0_32 = arith.constant 0 : index
    %69 = vector.load %arg3[%c5, %c0_32] : memref<16x128xf32, #tpu.memory_space<vmem>>, vector<1x128xf32>
    %70 = vector.broadcast %69 : vector<1x128xf32> to vector<8x128xf32>
    %71 = arith.addf %68, %70 : vector<8x128xf32>
    %cst_33 = arith.constant 0.000000e+00 : f32
    %72 = vector.broadcast %cst_33 : f32 to vector<8x128xf32>
    %73 = arith.maximumf %71, %72 : vector<8x128xf32>
    %74 = arith.truncf %73 : vector<8x128xf32> to vector<8x128xbf16>
    %c4_34 = arith.constant 4 : index
    %c0_35 = arith.constant 0 : index
    %c0_36 = arith.constant 0 : index
    %75 = vector.load %arg2[%c4_34, %c0_35, %c0_36] : memref<7x128x128xbf16, #tpu.memory_space<vmem>>, vector<1x128x128xbf16>
    %76 = vector.shape_cast %75 : vector<1x128x128xbf16> to vector<128x128xbf16>
    %cst_37 = arith.constant dense<0.000000e+00> : vector<8x128xf32>
    %77 = tpu.matmul %74, %76, %cst_37 {dimension_numbers = #tpu.dot_dimension_numbers<[1], [0], [0], [1], [0, 0, 1, 1], [], []>} : vector<8x128xbf16>, vector<128x128xbf16>, vector<8x128xf32> -> vector<8x128xf32>
    %c6 = arith.constant 6 : index
    %c0_38 = arith.constant 0 : index
    %78 = vector.load %arg3[%c6, %c0_38] : memref<16x128xf32, #tpu.memory_space<vmem>>, vector<1x128xf32>
    %79 = vector.broadcast %78 : vector<1x128xf32> to vector<8x128xf32>
    %80 = arith.addf %77, %79 : vector<8x128xf32>
    %81 = arith.addf %64, %80 : vector<8x128xf32>
    %cst_39 = arith.constant dense<0.000000e+00> : vector<8xf32>
    %82 = vector.multi_reduction <add>, %81, %cst_39 [1] : vector<8x128xf32> to vector<8xf32>
    %83 = vector.shape_cast %82 : vector<8xf32> to vector<8x1xf32>
    %cst_40 = arith.constant 1.562500e-02 : f32
    %84 = vector.broadcast %cst_40 : f32 to vector<8x1xf32>
    %85 = arith.mulf %83, %84 : vector<8x1xf32>
    %86 = vector.broadcast %85 : vector<8x1xf32> to vector<8x128xf32>
    %87 = arith.subf %81, %86 : vector<8x128xf32>
    %88 = arith.mulf %87, %34 : vector<8x128xf32>
    %89 = arith.mulf %88, %88 : vector<8x128xf32>
    %cst_41 = arith.constant dense<0.000000e+00> : vector<8xf32>
    %90 = vector.multi_reduction <add>, %89, %cst_41 [1] : vector<8x128xf32> to vector<8xf32>
    %91 = vector.shape_cast %90 : vector<8xf32> to vector<8x1xf32>
    %cst_42 = arith.constant 1.562500e-02 : f32
    %92 = vector.broadcast %cst_42 : f32 to vector<8x1xf32>
    %93 = arith.mulf %91, %92 : vector<8x1xf32>
    %cst_43 = arith.constant 9.99999974E-6 : f32
    %94 = vector.broadcast %cst_43 : f32 to vector<8x1xf32>
    %95 = arith.addf %93, %94 : vector<8x1xf32>
    %96 = math.rsqrt %95 : vector<8x1xf32>
    %97 = vector.broadcast %96 : vector<8x1xf32> to vector<8x128xf32>
    %98 = arith.mulf %88, %97 : vector<8x128xf32>
    %c7 = arith.constant 7 : index
    %c0_44 = arith.constant 0 : index
    %99 = vector.load %arg3[%c7, %c0_44] : memref<16x128xf32, #tpu.memory_space<vmem>>, vector<1x128xf32>
    %100 = vector.broadcast %99 : vector<1x128xf32> to vector<8x128xf32>
    %101 = arith.mulf %98, %100 : vector<8x128xf32>
    %c8 = arith.constant 8 : index
    %c0_45 = arith.constant 0 : index
    %102 = vector.load %arg3[%c8, %c0_45] : memref<16x128xf32, #tpu.memory_space<vmem>>, vector<1x128xf32>
    %103 = vector.broadcast %102 : vector<1x128xf32> to vector<8x128xf32>
    %104 = arith.addf %101, %103 : vector<8x128xf32>
    %105 = arith.truncf %104 : vector<8x128xf32> to vector<8x128xbf16>
    %c5_46 = arith.constant 5 : index
    %c0_47 = arith.constant 0 : index
    %c0_48 = arith.constant 0 : index
    %106 = vector.load %arg2[%c5_46, %c0_47, %c0_48] : memref<7x128x128xbf16, #tpu.memory_space<vmem>>, vector<1x128x128xbf16>
    %107 = vector.shape_cast %106 : vector<1x128x128xbf16> to vector<128x128xbf16>
    %cst_49 = arith.constant dense<0.000000e+00> : vector<8x128xf32>
    %108 = tpu.matmul %105, %107, %cst_49 {dimension_numbers = #tpu.dot_dimension_numbers<[1], [0], [0], [1], [0, 0, 1, 1], [], []>} : vector<8x128xbf16>, vector<128x128xbf16>, vector<8x128xf32> -> vector<8x128xf32>
    %c9 = arith.constant 9 : index
    %c0_50 = arith.constant 0 : index
    %109 = vector.load %arg3[%c9, %c0_50] : memref<16x128xf32, #tpu.memory_space<vmem>>, vector<1x128xf32>
    %110 = vector.broadcast %109 : vector<1x128xf32> to vector<8x128xf32>
    %111 = arith.addf %108, %110 : vector<8x128xf32>
    %cst_51 = arith.constant 0.000000e+00 : f32
    %112 = vector.broadcast %cst_51 : f32 to vector<8x128xf32>
    %113 = arith.maximumf %111, %112 : vector<8x128xf32>
    %114 = arith.truncf %113 : vector<8x128xf32> to vector<8x128xbf16>
    %c6_52 = arith.constant 6 : index
    %c0_53 = arith.constant 0 : index
    %c0_54 = arith.constant 0 : index
    %115 = vector.load %arg2[%c6_52, %c0_53, %c0_54] : memref<7x128x128xbf16, #tpu.memory_space<vmem>>, vector<1x128x128xbf16>
    %116 = vector.shape_cast %115 : vector<1x128x128xbf16> to vector<128x128xbf16>
    %cst_55 = arith.constant dense<0.000000e+00> : vector<8x128xf32>
    %117 = tpu.matmul %114, %116, %cst_55 {dimension_numbers = #tpu.dot_dimension_numbers<[1], [0], [0], [1], [0, 0, 1, 1], [], []>} : vector<8x128xbf16>, vector<128x128xbf16>, vector<8x128xf32> -> vector<8x128xf32>
    %c10 = arith.constant 10 : index
    %c0_56 = arith.constant 0 : index
    %118 = vector.load %arg3[%c10, %c0_56] : memref<16x128xf32, #tpu.memory_space<vmem>>, vector<1x128xf32>
    %119 = vector.broadcast %118 : vector<1x128xf32> to vector<8x128xf32>
    %120 = arith.addf %117, %119 : vector<8x128xf32>
    %cst_57 = arith.constant dense<0xFF800000> : vector<8xf32>
    %121 = vector.multi_reduction <maximumf>, %120, %cst_57 [1] : vector<8x128xf32> to vector<8xf32>
    %122 = vector.shape_cast %121 : vector<8xf32> to vector<8x1xf32>
    %123 = vector.broadcast %122 : vector<8x1xf32> to vector<8x128xf32>
    %124 = arith.cmpf oeq, %120, %123 : vector<8x128xf32>
    %c128_i32 = arith.constant 128 : i32
    %125 = vector.broadcast %c128_i32 : i32 to vector<8x128xi32>
    %126 = arith.select %124, %3, %125 : vector<8x128xi1>, vector<8x128xi32>
    %cst_58 = arith.constant dense<2147483647> : vector<8xi32>
    %127 = vector.multi_reduction <minsi>, %126, %cst_58 [1] : vector<8x128xi32> to vector<8xi32>
    %128 = vector.shape_cast %127 : vector<8xi32> to vector<8x1xi32>
    %129 = vector.shape_cast %128 : vector<8x1xi32> to vector<8x1xi32>
    %130 = vector.broadcast %129 : vector<8x1xi32> to vector<8x128xi32>
    %c0_59 = arith.constant 0 : index
    %c0_60 = arith.constant 0 : index
    %131 = vector.load %arg4[%c0_59, %c0_60] : memref<8x128xi32, #tpu.memory_space<vmem>>, vector<8x128xi32>
    tpu.vector_store %arg4[%c0_59, %c0_60], %130 {strides = array<i32>} : memref<8x128xi32, #tpu.memory_space<vmem>>, vector<8x128xi32>,
    return
  }
  func.func @transform_0(%arg0: i32) -> (i32, i32) {
    %c0_i32 = arith.constant 0 : i32
    %c0_i32_0 = arith.constant 0 : i32
    return %arg0, %c0_i32 : i32, i32
  }
  func.func @transform_1(%arg0: i32) -> (i32, i32, i32) {
    %c0_i32 = arith.constant 0 : i32
    %c0_i32_0 = arith.constant 0 : i32
    %c0_i32_1 = arith.constant 0 : i32
    %c0_i32_2 = arith.constant 0 : i32
    return %c0_i32, %c0_i32_0, %c0_i32_1 : i32, i32, i32
  }
  func.func @transform_2(%arg0: i32) -> (i32, i32) {
    %c0_i32 = arith.constant 0 : i32
    %c0_i32_0 = arith.constant 0 : i32
    %c0_i32_1 = arith.constant 0 : i32
    return %c0_i32, %c0_i32_0 : i32, i32
  }
  func.func @transform_3(%arg0: i32) -> (i32, i32) {
    %c0_i32 = arith.constant 0 : i32
    %c0_i32_0 = arith.constant 0 : i32
    return %arg0, %c0_i32 : i32, i32
  }
}

</mosaic_0001>

<bundles_post_ra>
// kernel: fuse_model_forward.1
= control target key start
LH: loop header
LB: loop body
LE: loop exit
PB: predicated region body
PF: predicated region fallthrough
CT: control target
= control target key end

     0   :  { %v1383_v0 = vmov 0.0   ;;  %vm1384_vm0 = vmmov 0   ;;  %vm32_vm1 = vcmask 523264   ;;  %v25_v49 = vlaneseq  ;;  %s1725_s0 = inlined_call_operand.vmem [shape: f32[80,128], index: 0, kind: input, shape index: {}]   ;;  %s1726_s1 = inlined_call_operand.vmem [shape: bf16[7,128,128], index: 1, kind: input, shape index: {}]   ;;  %s1727_s2 = inlined_call_operand.vmem [shape: f32[16,128], index: 2, kind: input, shape index: {}]   ;;  %s1728_s3 = inlined_call_operand.vmem [shape: s32[8,128], index: 3, kind: output, shape index: {}]  }
   0x1   :  { %1167 = vmatprep.subr.bf16.mxu0 %v1383_v0  ;;  %v15_v1 = vld [vmem:[%s1725_s0] sm:$0xff]  ;;  %v16_v2 = vld [vmem:[%s1725_s0 + $0x8] sm:$0xff]  ;;  %v17_v3 = vld [vmem:[%s1725_s0 + $0x10] sm:$0xff]  ;;  %1175 = vmatprep.mubr.msk.bf16.mxu0 %vm1384_vm0, %v1383_v0 }
   0x2   :  { %v28_v4 = vpack.c.bf16 %v16_v2, %v15_v1  ;;  %v18_v5 = vld [vmem:[%s1725_s0 + $0x18] sm:$0xff]  ;;  %1179 = vmatprep.subr.bf16.mxu1 %v1383_v0  ;;  %1195 = vmatprep.mubr.msk.bf16.mxu1 %vm1384_vm0, %v1383_v0  ;;  %v19_v6 = vld [vmem:[%s1725_s0 + $0x20] sm:$0xff]  ;;  %v20_v9 = vld [vmem:[%s1725_s0 + $0x28] sm:$0xff]  ;;  %v1540_v51 = vand.u32 127, %v25_v49 }
   0x3   :  { %v29_v7 = vpack.c.bf16 %v18_v5, %v17_v3  ;;  %v1321_v8 = vld [vmem:[%s1726_s1] sm:$0xff]   ;;  %v1322_v10 = vld [vmem:[%s1726_s1 + $0x8] sm:$0xff]   ;;  %v30_v11 = vpack.c.bf16 %v20_v9, %v19_v6  ;;  %v21_v12 = vld [vmem:[%s1725_s0 + $0x30] sm:$0xff] }
   0x4   :  { %1168 = vmatpush3.bf16.msra.mxu0 %v28_v4  ;;  %1180 = vmatpush3.bf16.msra.mxu1 %v1321_v8  ;;  %v22_v13 = vld [vmem:[%s1725_s0 + $0x38] sm:$0xff]  ;;  %v1323_v14 = vld [vmem:[%s1726_s1 + $0x10] sm:$0xff]   ;;  %v23_v15 = vld [vmem:[%s1725_s0 + $0x40] sm:$0xff]  ;;  %vm186_vm2 = vcmp.lt.s32.totalorder %v1540_v51, 32  ;;  %vm302_vm3 = vcmp.lt.s32.totalorder %v1540_v51, 64 }
   0x5   :  { %1169 = vmatprep.subr.bf16.mxu0 %v1383_v0  ;;  %1181 = vmatprep.subr.bf16.mxu1 %v1383_v0  ;;  %v31_v16 = vpack.c.bf16 %v22_v13, %v21_v12  ;;  %v1324_v17 = vld [vmem:[%s1726_s1 + $0x18] sm:$0xff]   ;;  %v27_v18 = vpack.c.bf16 %v23_v15, %v23_v15  ;;  %v1325_v19 = vld [vmem:[%s1726_s1 + $0x20] sm:$0xff]   ;;  %v1326_v20 = vld [vmem:[%s1726_s1 + $0x28] sm:$0xff]   ;;  %v1571_v13 = vsel %vm302_vm3, 1.0, %v1383_v0 }
   0x6   :  { %v1327_v21 = vld [vmem:[%s1726_s1 + $0x30] sm:$0xff]   ;;  %v1328_v22 = vld [vmem:[%s1726_s1 + $0x38] sm:$0xff]   ;;  %v1329_v23 = vld [vmem:[%s1726_s1 + $0x40] sm:$0xff]  }
   0x7   :  { %v1330_v24 = vld [vmem:[%s1726_s1 + $0x48] sm:$0xff]   ;;  %v1331_v25 = vld [vmem:[%s1726_s1 + $0x50] sm:$0xff]   ;;  %v1332_v26 = vld [vmem:[%s1726_s1 + $0x58] sm:$0xff]  }
   0x8   :  { %1170 = vmatpush3.bf16.msra.mxu0 %v29_v7  ;;  %1182 = vmatpush3.bf16.msra.mxu1 %v1322_v10  ;;  %v24_v27 = vld [vmem:[%s1725_s0 + $0x48] sm:$0xff]  ;;  %v1333_v34 = vld [vmem:[%s1726_s1 + $0x60] sm:$0xff]   ;;  %v1335_v36 = vld [vmem:[%s1726_s1 + $0x70] sm:$0xff]  }
   0x9   :  { %1171 = vmatprep.subr.bf16.mxu0 %v1383_v0  ;;  %1183 = vmatprep.subr.bf16.mxu1 %v1383_v0  ;;  %v1334_v35 = vld [vmem:[%s1726_s1 + $0x68] sm:$0xff]   ;;  %v1336_v37 = vld [vmem:[%s1726_s1 + $0x78] sm:$0xff]   ;;  %v1337_v38 = vld [vmem:[%s1726_s1 + $0x80] sm:$0xff]  }
   0xa   :  { %v1338_v39 = vld [vmem:[%s1726_s1 + $0x88] sm:$0xff]   ;;  %v1339_v40 = vld [vmem:[%s1726_s1 + $0x90] sm:$0xff]   ;;  %v1340_v41 = vld [vmem:[%s1726_s1 + $0x98] sm:$0xff]  }
   0xb   :  { %v1341_v42 = vld [vmem:[%s1726_s1 + $0xa0] sm:$0xff]   ;;  %v1342_v43 = vld [vmem:[%s1726_s1 + $0xa8] sm:$0xff]   ;;  %v1343_v56 = vld [vmem:[%s1726_s1 + $0xb0] sm:$0xff]  }
   0xc   :  { %1172 = vmatpush3.bf16.msra.mxu0 %v30_v11  ;;  %1184 = vmatpush3.bf16.msra.mxu1 %v1323_v14  ;;  %v935_v44 = vld [vmem:[%s1727_s2] ss:$0 sm:$0xff]  ;;  %v1344_v57 = vld [vmem:[%s1726_s1 + $0xb8] sm:$0xff]   ;;  %v960_v58 = vld [vmem:[%s1727_s2 + $0x1] ss:$0 sm:$0xff] }
   0xd   :  { %1173 = vmatprep.subr.bf16.mxu0 %v1383_v0  ;;  %1185 = vmatprep.subr.bf16.mxu1 %v1383_v0  ;;  %v986_v3 = vld [vmem:[%s1727_s2 + $0x2] ss:$0 sm:$0xff]  ;;  %v1346_v10 = vld [vmem:[%s1726_s1 + $0xc8] sm:$0xff]   ;;  %v1038_v49 = vld [vmem:[%s1727_s2 + $0x6] ss:$0 sm:$0xff] }
   0xe   :  { %v1345_v9 = vld [vmem:[%s1726_s1 + $0xc0] sm:$0xff]  }
  0x10   :  { %1174 = vmatpush3.bf16.msra.mxu0 %v31_v16  ;;  %1186 = vmatpush3.bf16.msra.mxu1 %v1324_v17  ;;  %v1347_v17 = vld [vmem:[%s1726_s1 + $0xd0] sm:$0xff]  }
  0x11   :  { %1199 = vmatprep.subr.bf16.mxu0 %v1383_v0  ;;  %1187 = vmatprep.subr.bf16.mxu1 %v1383_v0 }
  0x13   :  { %1176 = vmatmul.mubr.msk.bf16.vlgmr.msra.gmra.mrb[0].mxu0 %vm32_vm1, %v27_v18  ;;  %v1348_v18 = vld [vmem:[%s1726_s1 + $0xd8] sm:$0xff]  }
  0x14   :  { %1215 = vmatprep.mubr.msk.bf16.mxu0 %vm1384_vm0, %v1383_v0  ;;  %1188 = vmatpush3.bf16.msra.mxu1 %v1325_v19  ;;  %v1349_v19 = vld [vmem:[%s1726_s1 + $0xe0] sm:$0xff]  }
  0x15   :  { %1189 = vmatprep.subr.bf16.mxu1 %v1383_v0  ;;  %1200 = vmatpush3.bf16.msra.mxu0 %v1329_v23  ;;  %v1353_v23 = vld [vmem:[%s1726_s1 + $0x100] sm:$0xff]  }
  0x16   :  { %1201 = vmatprep.subr.bf16.mxu0 %v1383_v0 }
  0x18   :  { %1190 = vmatpush3.bf16.msra.mxu1 %v1326_v20  ;;  %v1350_v20 = vld [vmem:[%s1726_s1 + $0xe8] sm:$0xff]  }
  0x19   :  { %1191 = vmatprep.subr.bf16.mxu1 %v1383_v0  ;;  %1202 = vmatpush3.bf16.msra.mxu0 %v1330_v24  ;;  %v1354_v24 = vld [vmem:[%s1726_s1 + $0x108] sm:$0xff]  }
  0x1a   :  { %1203 = vmatprep.subr.bf16.mxu0 %v1383_v0 }
  0x1c   :  { %1192 = vmatpush3.bf16.msra.mxu1 %v1327_v21  ;;  %v1351_v21 = vld [vmem:[%s1726_s1 + $0xf0] sm:$0xff]  }
  0x1d   :  { %1193 = vmatprep.subr.bf16.mxu1 %v1383_v0  ;;  %1204 = vmatpush3.bf16.msra.mxu0 %v1331_v25  ;;  %v1355_v25 = vld [vmem:[%s1726_s1 + $0x110] sm:$0xff]  }
  0x1e   :  { %1205 = vmatprep.subr.bf16.mxu0 %v1383_v0 }
  0x20   :  { %1194 = vmatpush3.bf16.msra.mxu1 %v1328_v22  ;;  %v1352_v22 = vld [vmem:[%s1726_s1 + $0xf8] sm:$0xff]  }
  0x21   :  { %1219 = vmatprep.subr.bf16.mxu1 %v1383_v0  ;;  %1206 = vmatpush3.bf16.msra.mxu0 %v1332_v26  ;;  %v1356_v26 = vld [vmem:[%s1726_s1 + $0x118] sm:$0xff]  }
  0x22   :  { %1207 = vmatprep.subr.bf16.mxu0 %v1383_v0 }
  0x25   :  { %1208 = vmatpush3.bf16.msra.mxu0 %v1333_v34 }
  0x26   :  { %1209 = vmatprep.subr.bf16.mxu0 %v1383_v0 }
  0x29   :  { %1210 = vmatpush3.bf16.msra.mxu0 %v1334_v35  ;;  %v996_v35 = vld [vmem:[%s1727_s2 + $0x4] ss:$0 sm:$0xff] }
  0x2a   :  { %1211 = vmatprep.subr.bf16.mxu0 %v1383_v0 }
  0x2d   :  { %1212 = vmatpush3.bf16.msra.mxu0 %v1335_v36 }
  0x2e   :  { %1213 = vmatprep.subr.bf16.mxu0 %v1383_v0 }
  0x31   :  { %1214 = vmatpush3.bf16.msra.mxu0 %v1336_v37 }
  0x32   :  { %1239 = vmatprep.subr.bf16.mxu0 %v1383_v0 }
  0xe6   :  { %v70_v28 = vpop.f32.mrb[0].mxu0 }
  0xe7   :  { %v71_v29 = vadd.f32 %v70_v28, %v24_v27  ;;  %v1177_v30 = vpop.f32.mrb[1].mxu0  ;;  %v1357_v27 = vld [vmem:[%s1726_s1 + $0x120] sm:$0xff]   ;;  %v1358_v28 = vld [vmem:[%s1726_s1 + $0x128] sm:$0xff]  }
  0xe8   :  { %v73_v31 = vpop.f32.mrb[2].mxu0 }
  0xe9   :  { %v76_v32 = vpack.c.bf16 %v71_v29, %v71_v29  ;;  %v1178_v33 = vpop.f32.mrb[3].mxu0 }
  0xea   :  { %v995_v33 = vld [vmem:[%s1727_s2 + $0x3] ss:$0 sm:$0xff] }
  0xeb   :  { %1196 = vmatmul.mubr.bf16.vlgmr.msra.gmra.mrb[0].mxu1 %v76_v32 }
  0xec   :  { %1235 = vmatprep.mubr.msk.bf16.mxu1 %vm1384_vm0, %v1383_v0  ;;  %1220 = vmatpush3.bf16.msra.mxu1 %v1337_v38 }
  0xed   :  { %1221 = vmatprep.subr.bf16.mxu1 %v1383_v0 }
  0xf0   :  { %1222 = vmatpush3.bf16.msra.mxu1 %v1338_v39  ;;  %v1359_v39 = vld [vmem:[%s1726_s1 + $0x130] sm:$0xff]  }
  0xf1   :  { %1223 = vmatprep.subr.bf16.mxu1 %v1383_v0 }
  0xf4   :  { %1224 = vmatpush3.bf16.msra.mxu1 %v1339_v40  ;;  %v1360_v40 = vld [vmem:[%s1726_s1 + $0x138] sm:$0xff]  }
  0xf5   :  { %1225 = vmatprep.subr.bf16.mxu1 %v1383_v0 }
  0xf8   :  { %1226 = vmatpush3.bf16.msra.mxu1 %v1340_v41  ;;  %v1013_v41 = vld [vmem:[%s1727_s2 + $0x5] ss:$0 sm:$0xff] }
  0xf9   :  { %1227 = vmatprep.subr.bf16.mxu1 %v1383_v0 }
  0xfc   :  { %1228 = vmatpush3.bf16.msra.mxu1 %v1341_v42 }
  0xfd   :  { %1229 = vmatprep.subr.bf16.mxu1 %v1383_v0 }
 0x100   :  { %1230 = vmatpush3.bf16.msra.mxu1 %v1342_v43 }
 0x101   :  { %1231 = vmatprep.subr.bf16.mxu1 %v1383_v0 }
 0x104   :  { %1232 = vmatpush3.bf16.msra.mxu1 %v1343_v56 }
 0x105   :  { %1233 = vmatprep.subr.bf16.mxu1 %v1383_v0 }
 0x108   :  { %1234 = vmatpush3.bf16.msra.mxu1 %v1344_v57  ;;  %v1361_v57 = vld [vmem:[%s1726_s1 + $0x140] sm:$0xff]  }
 0x109   :  { %1259 = vmatprep.subr.bf16.mxu1 %v1383_v0 }
 0x1be   :  { %v180_v45 = vpop.f32.mrb[0].mxu1 }
 0x1bf   :  { %v181_v46 = vadd.f32 %v935_v44, %v180_v45  ;;  %v1197_v47 = vpop.f32.mrb[1].mxu1 }
 0x1c0   :  { %v183_v48 = vpop.f32.mrb[2].mxu1 }
 0x1c1   :  { %1377 = vtanh.f32 %v181_v46  ;;  %v1198_v50 = vpop.f32.mrb[3].mxu1  ;;  %v188_v52 = vmax.f32 %v181_v46, 0.0 }
 0x1cb   :  { %v1378_v53 = vpop.eup %1377 }
 0x1cc   :  { %v189_v54 = vsel %vm186_vm2, %v1378_v53, %v188_v52 }
 0x1cd   :  { %v190_v55 = vpack.c.bf16 %v189_v54, %v189_v54 }
 0x1cf   :  { %1216 = vmatmul.mubr.bf16.vlgmr.msra.gmra.mrb[4].mxu0 %v190_v55 }
 0x1d0   :  { %1255 = vmatprep.mubr.msk.bf16.mxu0 %vm1384_vm0, %v1383_v0  ;;  %1240 = vmatpush3.bf16.msra.mxu0 %v1345_v9  ;;  %v1371_v9 = vld [vmem:[%s1726_s1 + $0x190] sm:$0xff]  }
 0x1d1   :  { %1241 = vmatprep.subr.bf16.mxu0 %v1383_v0 }
 0x1d4   :  { %1242 = vmatpush3.bf16.msra.mxu0 %v1346_v10  ;;  %v1372_v10 = vld [vmem:[%s1726_s1 + $0x198] sm:$0xff]  }
 0x1d5   :  { %1243 = vmatprep.subr.bf16.mxu0 %v1383_v0 }
 0x1d8   :  { %1244 = vmatpush3.bf16.msra.mxu0 %v1347_v17  ;;  %v1047_v17 = vld [vmem:[%s1727_s2 + $0x7] ss:$0 sm:$0xff] }
 0x1d9   :  { %1245 = vmatprep.subr.bf16.mxu0 %v1383_v0 }
 0x1dc   :  { %1246 = vmatpush3.bf16.msra.mxu0 %v1348_v18 }
 0x1dd   :  { %1247 = vmatprep.subr.bf16.mxu0 %v1383_v0 }
 0x1e0   :  { %1248 = vmatpush3.bf16.msra.mxu0 %v1349_v19  ;;  %v1048_v19 = vld [vmem:[%s1727_s2 + $0x8] ss:$0 sm:$0xff] }
 0x1e1   :  { %1249 = vmatprep.subr.bf16.mxu0 %v1383_v0 }
 0x1e4   :  { %1250 = vmatpush3.bf16.msra.mxu0 %v1350_v20 }
 0x1e5   :  { %1251 = vmatprep.subr.bf16.mxu0 %v1383_v0 }
 0x1e8   :  { %1252 = vmatpush3.bf16.msra.mxu0 %v1351_v21 }
 0x1e9   :  { %1253 = vmatprep.subr.bf16.mxu0 %v1383_v0 }
 0x1ec   :  { %1254 = vmatpush3.bf16.msra.mxu0 %v1352_v22 }
 0x1ed   :  { %1279 = vmatprep.subr.bf16.mxu0 %v1383_v0 }
 0x2a2   :  { %v295_v59 = vpop.f32.mrb[4].mxu0 }
 0x2a3   :  { %v296_v60 = vadd.f32 %v960_v58, %v295_v59  ;;  %v1217_v61 = vpop.f32.mrb[5].mxu0  ;;  %v1362_v58 = vld [vmem:[%s1726_s1 + $0x148] sm:$0xff]  }
 0x2a4   :  { %v298_v62 = vpop.f32.mrb[6].mxu0 }
 0x2a5   :  { %v301_v63 = vmax.f32 %v296_v60, 0.0  ;;  %v1218_v1 = vpop.f32.mrb[7].mxu0 }
 0x2a6   :  { %v1363_v1 = vld [vmem:[%s1726_s1 + $0x150] sm:$0xff]  }
 0x2a7   :  { %v305_v2 = vpack.c.bf16 %v301_v63, %v301_v63 }
 0x2a9   :  { %1236 = vmatmul.mubr.bf16.vlgmr.msra.gmra.mrb[4].mxu1 %v305_v2  ;;  %v1364_v2 = vld [vmem:[%s1726_s1 + $0x158] sm:$0xff]  }
 0x2aa   :  { %1275 = vmatprep.mubr.msk.bf16.mxu1 %vm1384_vm0, %v1383_v0  ;;  %1260 = vmatpush3.bf16.msra.mxu1 %v1353_v23  ;;  %v1375_v23 = vld [vmem:[%s1726_s1 + $0x1b0] sm:$0xff]  }
 0x2ab   :  { %1261 = vmatprep.subr.bf16.mxu1 %v1383_v0 }
 0x2ae   :  { %1262 = vmatpush3.bf16.msra.mxu1 %v1354_v24  ;;  %v1376_v24 = vld [vmem:[%s1726_s1 + $0x1b8] sm:$0xff]  }
 0x2af   :  { %1263 = vmatprep.subr.bf16.mxu1 %v1383_v0 }
 0x2b2   :  { %1264 = vmatpush3.bf16.msra.mxu1 %v1355_v25  ;;  %v1065_v25 = vld [vmem:[%s1727_s2 + $0x9] ss:$0 sm:$0xff] }
 0x2b3   :  { %1265 = vmatprep.subr.bf16.mxu1 %v1383_v0 }
 0x2b6   :  { %1266 = vmatpush3.bf16.msra.mxu1 %v1356_v26 }
 0x2b7   :  { %1267 = vmatprep.subr.bf16.mxu1 %v1383_v0 }
 0x2ba   :  { %1268 = vmatpush3.bf16.msra.mxu1 %v1357_v27 }
 0x2bb   :  { %1269 = vmatprep.subr.bf16.mxu1 %v1383_v0 }
 0x2be   :  { %1270 = vmatpush3.bf16.msra.mxu1 %v1358_v28 }
 0x2bf   :  { %1271 = vmatprep.subr.bf16.mxu1 %v1383_v0 }
 0x2c2   :  { %1272 = vmatpush3.bf16.msra.mxu1 %v1359_v39 }
 0x2c3   :  { %1273 = vmatprep.subr.bf16.mxu1 %v1383_v0 }
 0x2c6   :  { %1274 = vmatpush3.bf16.msra.mxu1 %v1360_v40 }
 0x2c7   :  { %1299 = vmatprep.subr.bf16.mxu1 %v1383_v0 }
 0x37c   :  { %v410_v4 = vpop.f32.mrb[4].mxu1 }
 0x37d   :  { %v411_v5 = vadd.f32 %v986_v3, %v410_v4  ;;  %v1237_v6 = vpop.f32.mrb[5].mxu1  ;;  %v1365_v3 = vld [vmem:[%s1726_s1 + $0x160] sm:$0xff]   ;;  %v1366_v4 = vld [vmem:[%s1726_s1 + $0x168] sm:$0xff]  }
 0x37e   :  { %v413_v7 = vpop.f32.mrb[6].mxu1  ;;  %v1368_v6 = vld [vmem:[%s1726_s1 + $0x178] sm:$0xff]  }
 0x37f   :  { %416 = vadd.xlane.f32.xlu0 %v411_v5  ;;  %v1238_v8 = vpop.f32.mrb[7].mxu1  ;;  %v1369_v7 = vld [vmem:[%s1726_s1 + $0x180] sm:$0xff]  }
 0x380   :  { %v1370_v8 = vld [vmem:[%s1726_s1 + $0x188] sm:$0xff]  }
 0x40c   :  { %v417_v11 = vpop.xlane.xlu0 %416 }
 0x40d   :  { %v418_v12 = vmul.f32 0.015625, %v417_v11  ;;  %v1373_v11 = vld [vmem:[%s1726_s1 + $0x1a0] sm:$0xff]  }
 0x40f   :  { %v419_v14 = vsub.f32 %v411_v5, %v418_v12  ;;  %v1367_v5 = vld [vmem:[%s1726_s1 + $0x170] sm:$0xff]   ;;  %v1374_v12 = vld [vmem:[%s1726_s1 + $0x1a8] sm:$0xff]  }
 0x411   :  { %v420_v15 = vmul.f32 %v1571_v13, %v419_v14 }
 0x413   :  { %v421_v16 = vmul.f32 %v420_v15, %v420_v15 }
 0x415   :  { %422 = vadd.xlane.f32.xlu0 %v421_v16 }
 0x4a2   :  { %v423_v29 = vpop.xlane.xlu0 %422 }
 0x4a3   :  { %v424_v30 = vmul.f32 0.015625, %v423_v29 }
 0x4a5   :  { %v425_v31 = vadd.f32 1e-05, %v424_v30 }
 0x4a7   :  { %1379 = vrsqrt.f32 %v425_v31 }
 0x4b1   :  { %v1380_v32 = vpop.eup %1379 }
 0x4b2   :  { %v427_v34 = vmul.f32 %v1380_v32, %v420_v15 }
 0x4b4   :  { %v433_v36 = vmul.f32 %v995_v33, %v427_v34 }
 0x4b6   :  { %v439_v37 = vadd.f32 %v996_v35, %v433_v36 }
 0x4b8   :  { %v440_v38 = vpack.c.bf16 %v439_v37, %v439_v37 }
 0x4ba   :  { %1256 = vmatmul.mubr.bf16.vlgmr.msra.gmra.mrb[8].mxu0 %v440_v38 }
 0x4bb   :  { %1295 = vmatprep.mubr.msk.bf16.mxu0 %vm1384_vm0, %v1383_v0  ;;  %1280 = vmatpush3.bf16.msra.mxu0 %v1361_v57 }
 0x4bc   :  { %1281 = vmatprep.subr.bf16.mxu0 %v1383_v0 }
 0x4bf   :  { %1282 = vmatpush3.bf16.msra.mxu0 %v1362_v58 }
 0x4c0   :  { %1283 = vmatprep.subr.bf16.mxu0 %v1383_v0 }
 0x4c3   :  { %1284 = vmatpush3.bf16.msra.mxu0 %v1363_v1 }
 0x4c4   :  { %1285 = vmatprep.subr.bf16.mxu0 %v1383_v0 }
 0x4c7   :  { %1286 = vmatpush3.bf16.msra.mxu0 %v1364_v2 }
 0x4c8   :  { %1287 = vmatprep.subr.bf16.mxu0 %v1383_v0 }
 0x4cb   :  { %1288 = vmatpush3.bf16.msra.mxu0 %v1365_v3 }
 0x4cc   :  { %1289 = vmatprep.subr.bf16.mxu0 %v1383_v0 }
 0x4cf   :  { %1290 = vmatpush3.bf16.msra.mxu0 %v1366_v4 }
 0x4d0   :  { %1291 = vmatprep.subr.bf16.mxu0 %v1383_v0 }
 0x4d3   :  { %1292 = vmatpush3.bf16.msra.mxu0 %v1367_v5 }
 0x4d4   :  { %1293 = vmatprep.subr.bf16.mxu0 %v1383_v0 }
 0x4d7   :  { %1294 = vmatpush3.bf16.msra.mxu0 %v1368_v6 }
 0x58d   :  { %v545_v42 = vpop.f32.mrb[8].mxu0 }
 0x58e   :  { %v546_v43 = vadd.f32 %v1013_v41, %v545_v42  ;;  %v1257_v44 = vpop.f32.mrb[9].mxu0 }
 0x58f   :  { %v548_v45 = vpop.f32.mrb[10].mxu0 }
 0x590   :  { %v551_v46 = vmax.f32 %v546_v43, 0.0  ;;  %v1258_v47 = vpop.f32.mrb[11].mxu0 }
 0x592   :  { %v552_v48 = vpack.c.bf16 %v551_v46, %v551_v46 }
 0x594   :  { %1276 = vmatmul.mubr.bf16.vlgmr.msra.gmra.mrb[8].mxu1 %v552_v48 }
 0x595   :  { %1315 = vmatprep.mubr.msk.bf16.mxu1 %vm1384_vm0, %v1383_v0  ;;  %1300 = vmatpush3.bf16.msra.mxu1 %v1369_v7 }
 0x596   :  { %1301 = vmatprep.subr.bf16.mxu1 %v1383_v0 }
 0x599   :  { %1302 = vmatpush3.bf16.msra.mxu1 %v1370_v8 }
 0x59a   :  { %1303 = vmatprep.subr.bf16.mxu1 %v1383_v0 }
 0x59d   :  { %1304 = vmatpush3.bf16.msra.mxu1 %v1371_v9 }
 0x59e   :  { %1305 = vmatprep.subr.bf16.mxu1 %v1383_v0 }
 0x5a1   :  { %1306 = vmatpush3.bf16.msra.mxu1 %v1372_v10 }
 0x5a2   :  { %1307 = vmatprep.subr.bf16.mxu1 %v1383_v0 }
 0x5a5   :  { %1308 = vmatpush3.bf16.msra.mxu1 %v1373_v11 }
 0x5a6   :  { %1309 = vmatprep.subr.bf16.mxu1 %v1383_v0 }
 0x5a9   :  { %1310 = vmatpush3.bf16.msra.mxu1 %v1374_v12 }
 0x5aa   :  { %1311 = vmatprep.subr.bf16.mxu1 %v1383_v0 }
 0x5ad   :  { %1312 = vmatpush3.bf16.msra.mxu1 %v1375_v23 }
 0x5ae   :  { %1313 = vmatprep.subr.bf16.mxu1 %v1383_v0  ;;  %v1090_v0 = vld [vmem:[%s1727_s2 + $0xa] ss:$0 sm:$0xff] }
 0x5b1   :  { %1314 = vmatpush3.bf16.msra.mxu1 %v1376_v24 }
 0x667   :  { %v657_v50 = vpop.f32.mrb[8].mxu1 }
 0x668   :  { %v658_v52 = vadd.f32 %v1038_v49, %v657_v50  ;;  %v1277_v53 = vpop.f32.mrb[9].mxu1 }
 0x669   :  { %v660_v54 = vpop.f32.mrb[10].mxu1 }
 0x66a   :  { %v1278_v55 = vpop.f32.mrb[11].mxu1  ;;  %v663_v56 = vadd.f32 %v658_v52, %v439_v37 }
 0x66c   :  { %664 = vadd.xlane.f32.xlu1 %v663_v56 }
 0x6f9   :  { %v665_v59 = vpop.xlane.xlu1 %664 }
 0x6fa   :  { %v666_v60 = vmul.f32 0.015625, %v665_v59 }
 0x6fc   :  { %v667_v61 = vsub.f32 %v663_v56, %v666_v60 }
 0x6fe   :  { %v668_v62 = vmul.f32 %v1571_v13, %v667_v61 }
 0x700   :  { %v669_v63 = vmul.f32 %v668_v62, %v668_v62 }
 0x702   :  { %670 = vadd.xlane.f32.xlu1 %v669_v63 }
 0x78f   :  { %v671_v13 = vpop.xlane.xlu1 %670 }
 0x790   :  { %v672_v14 = vmul.f32 0.015625, %v671_v13 }
 0x792   :  { %v673_v15 = vadd.f32 1e-05, %v672_v14 }
 0x794   :  { %1381 = vrsqrt.f32 %v673_v15 }
 0x79e   :  { %v1382_v16 = vpop.eup %1381 }
 0x79f   :  { %v675_v18 = vmul.f32 %v1382_v16, %v668_v62 }
 0x7a1   :  { %v681_v20 = vmul.f32 %v1047_v17, %v675_v18 }
 0x7a3   :  { %v687_v21 = vadd.f32 %v1048_v19, %v681_v20 }
 0x7a5   :  { %v688_v22 = vpack.c.bf16 %v687_v21, %v687_v21 }
 0x7a7   :  { %1296 = vmatmul.mubr.bf16.vlgmr.msra.gmra.mrb[12].mxu0 %v688_v22 }
 0x87a   :  { %v793_v26 = vpop.f32.mrb[12].mxu0 }
 0x87b   :  { %v794_v27 = vadd.f32 %v1065_v25, %v793_v26  ;;  %v1297_v28 = vpop.f32.mrb[13].mxu0 }
 0x87c   :  { %v796_v29 = vpop.f32.mrb[14].mxu0 }
 0x87d   :  { %v799_v30 = vmax.f32 %v794_v27, 0.0  ;;  %v1298_v31 = vpop.f32.mrb[15].mxu0 }
 0x87f   :  { %v800_v32 = vpack.c.bf16 %v799_v30, %v799_v30 }
 0x881   :  { %1316 = vmatmul.mubr.bf16.vlgmr.msra.gmra.mrb[12].mxu1 %v800_v32 }
 0x954   :  { %v905_v33 = vpop.f32.mrb[12].mxu1 }
 0x955   :  { %v906_v34 = vadd.f32 %v1090_v0, %v905_v33  ;;  %v1317_v35 = vpop.f32.mrb[13].mxu1 }
 0x956   :  { %v908_v36 = vpop.f32.mrb[14].mxu1 }
 0x957   :  { %911 = vmax.xlane.f32.xlu0 %v906_v34  ;;  %v1318_v37 = vpop.f32.mrb[15].mxu1 }
 0x9e4   :  { %v912_v38 = vpop.xlane.xlu0 %911 }
 0x9e5   :  { %vm913_vm4 = vcmp.eq.f32.partialorder %v906_v34, %v912_v38 }
 0x9e6   :  { %v914_v39 = vsel %vm913_vm4, %v1540_v51, 128 }
 0x9e7   :  { %v916_v40 = vshra.s32 %v914_v39, 16  ;;  %v915_v42 = vand.u32 65535, %v914_v39 }
 0x9e9   :  { %v918_v41 = vcvt.s32.f32 %v916_v40  ;;  %v917_v44 = vcvt.s32.f32 %v915_v42 }
 0x9eb   :  { %919 = vmin.xlane.f32.xlu1 %v918_v41 }
 0xa78   :  { %v920_v43 = vpop.xlane.xlu1 %919 }
 0xa79   :  { %vm921_vm5 = vcmp.eq.f32.partialorder %v918_v41, %v920_v43  ;;  %v926_v46 = vcvt.f32.s32 %v920_v43 }
 0xa7a   :  { %v922_v45 = vsel %vm921_vm5, %v917_v44, inf }
 0xa7b   :  { %923 = vmin.xlane.f32.xlu0 %v922_v45  ;;  %v927_v48 = vshll.u32 %v926_v46, 16 }
 0xb08   :  { %v924_v47 = vpop.xlane.xlu0 %923 }
 0xb09   :  { %v925_v49 = vcvt.f32.s32 %v924_v47 }
 0xb0b   :  { %v928_v50 = vadd.s32 %v927_v48, %v925_v49 }
 0xb0d   :  { %929 = vst [vmem:[%s1728_s3] sm:$0xff] %v928_v50 }

</bundles_post_ra>
